<compile_context>
chip_gen: v7x
topology: tpu7x:2x2x1
jax: 0.10.0
libtpu: 0.0.40
codegen_flags: <defaults>
</compile_context>

<pallas_src>
import jax
import jax.numpy as jnp
from jax.experimental import pallas as pl
from jax.experimental.pallas import tpu as pltpu


def _td_linear_kernel(x_ref, w_ref, b_ref, o_ref):
    # x_ref: (1, F, Tt)   w_ref: (OUT, F)   b_ref: (OUT, 1)   o_ref: (1, OUT, Tt)
    y = jnp.dot(w_ref[...], x_ref[0], preferred_element_type=jnp.float32)  # (OUT, Tt)
    o_ref[0] = (y + b_ref[...]).astype(o_ref.dtype)


def _round_up(n, m):
    return ((n + m - 1) // m) * m


def _pick_t_tile(t_pad):
    # t_pad is already a multiple of 128; pick the largest standard tile that divides it.
    for tt in (512, 256, 128):
        if t_pad % tt == 0:
            return tt
    return 128


def _linear_pallas(x_bft, weight_of, bias_o):
    """y[b, :, t] = W @ x[b, :, t] + b  computed with a Pallas kernel.

    x_bft:     (B, F, T)   float32 (native PyTorch TimeDistributed input layout)
    weight_of: (OUT, F)    float32 (PyTorch nn.Linear weight layout, used as-is)
    bias_o:    (OUT,)      float32
    returns:   (B, OUT, T) float32
    """
    B, F, T = x_bft.shape
    OUT = weight_of.shape[0]

    # Pad T up to a multiple of 128 so the output tile is lane-dense.
    T_pad = _round_up(max(T, 1), 128)
    Tt = _pick_t_tile(T_pad)
    if T_pad != T:
        x_bft = jnp.pad(x_bft, ((0, 0), (0, 0), (0, T_pad - T)))

    bias_2d = bias_o.reshape(OUT, 1)
    n_t_tiles = T_pad // Tt

    itemsize = jnp.dtype(x_bft.dtype).itemsize
    cost = pl.CostEstimate(
        flops=2 * B * T_pad * F * OUT,
        transcendentals=0,
        bytes_accessed=(B * F * T_pad + OUT * F + OUT + B * OUT * T_pad) * itemsize,
    )

    y_pad = pl.pallas_call(
        _td_linear_kernel,
        out_shape=jax.ShapeDtypeStruct((B, OUT, T_pad), x_bft.dtype),
        grid_spec=pltpu.PrefetchScalarGridSpec(
            num_scalar_prefetch=0,
            grid=(B, n_t_tiles),
            in_specs=[
                pl.BlockSpec((1, F, Tt), lambda b, t: (b, 0, t)),
                pl.BlockSpec((OUT, F), lambda b, t: (0, 0)),     # resident weight
                pl.BlockSpec((OUT, 1), lambda b, t: (0, 0)),     # resident bias
            ],
            out_specs=pl.BlockSpec((1, OUT, Tt), lambda b, t: (b, 0, t)),
        ),
        compiler_params=pltpu.CompilerParams(
            dimension_semantics=("parallel", "parallel"),
            vmem_limit_bytes=32 * 1024 * 1024,   # safe on v5e/v6e/v7x
        ),
        cost_estimate=cost,
    )(x_bft, weight_of, bias_2d)

    if T_pad != T:
        y_pad = y_pad[:, :, :T]
    return y_pad


def time_distributed_forward(x, weight_of, bias_o):
    """TimeDistributed(nn.Linear(F, OUT)).forward(x).

    weight_of: (OUT, F)  (PyTorch nn.Linear weight layout)
    bias_o:    (OUT,)
    """
    assert x.ndim <= 3

    if x.ndim <= 2:
        # Inner module applied directly (no permute in the PyTorch module).
        # Small/legacy path: feed as (B=1, F, T=N) and un-flip the tiny result.
        if x.ndim == 1:
            x3 = x.reshape(1, x.shape[0], 1)                  # (1, F, 1)
            y3 = _linear_pallas(x3, weight_of, bias_o)        # (1, OUT, 1)
            return y3.reshape(weight_of.shape[0])             # (OUT,)
        # x: (N, F)
        x3 = jnp.transpose(x, (1, 0))[None]                   # (1, F, N)
        y3 = _linear_pallas(x3, weight_of, bias_o)            # (1, OUT, N)
        return jnp.transpose(y3[0], (1, 0))                   # (N, OUT)

    # 3-D path: consume native (B, F, T); kernel emits (B, OUT, T) directly.
    return _linear_pallas(x, weight_of, bias_o)


if __name__ == "__main__":
    key = jax.random.PRNGKey(0)
    k_x, k_w, k_b = jax.random.split(key, 3)

    B, F, T = 2, 4, 8      # (batch, features, time) — PyTorch-style input layout
    OUT = 32               # hidden size of the wrapped nn.Linear(F, OUT)

    x = jax.random.normal(k_x, (B, F, T), dtype=jnp.float32)

    # Deterministic nn.Linear-style init: U(-1/sqrt(F), 1/sqrt(F))
    bound = 1.0 / (F ** 0.5)
    weight_of = jax.random.uniform(k_w, (OUT, F), dtype=jnp.float32,
                                   minval=-bound, maxval=bound)
    bias_o = jax.random.uniform(k_b, (OUT,), dtype=jnp.float32,
                                minval=-bound, maxval=bound)

    y = time_distributed_forward(x, weight_of, bias_o)
    y = jax.block_until_ready(y)

    # Reference check (pure JAX) of the exact PyTorch semantics:
    # permute -> Linear -> permute back  ==  einsum('of,bft->bot') + bias.
    ref = jnp.einsum("of,bft->bot", weight_of, x) + bias_o[None, :, None]
    assert y.shape == (B, OUT, T), y.shape
    assert jnp.allclose(y, ref, atol=1e-5, rtol=1e-5), "mismatch vs reference (3-D)"

    # Also exercise the <=2-D direct-apply path.
    x2 = jax.random.normal(k_x, (5, F), dtype=jnp.float32)
    y2 = jax.block_until_ready(time_distributed_forward(x2, weight_of, bias_o))
    ref2 = x2 @ weight_of.T + bias_o
    assert y2.shape == (5, OUT), y2.shape
    assert jnp.allclose(y2, ref2, atol=1e-5, rtol=1e-5), "mismatch vs reference (2-D)"

    print("KERNEL_OK")
</pallas_src>

<mosaic_0001>
module attributes {stable_mosaic.version = 11 : i64} {
  func.func @_td_linear_kernel(%arg0: i32, %arg1: i32, %arg2: memref<1x4x128xf32, #tpu.memory_space<vmem>>, %arg3: memref<32x4xf32, #tpu.memory_space<vmem>>, %arg4: memref<32x1xf32, #tpu.memory_space<vmem>>, %arg5: memref<1x32x128xf32, #tpu.memory_space<vmem>>) attributes {dimension_semantics = [#tpu.dimension_semantics<parallel>, #tpu.dimension_semantics<parallel>], iteration_bounds = array<i64: 2, 1>, scalar_prefetch = 0 : i64, scratch_operands = 0 : i64, tpu.core_type = #tpu.core_type<tc>, window_params = [{transform_indices = @transform_0, window_bounds = array<i64: 1, 4, 128>}, {pipeline_mode = #tpu.pipeline_mode<synchronous>, transform_indices = @transform_1, window_bounds = array<i64: 32, 4>}, {pipeline_mode = #tpu.pipeline_mode<synchronous>, transform_indices = @transform_2, window_bounds = array<i64: 32, 1>}, {transform_indices = @transform_3, window_bounds = array<i64: 1, 32, 128>}]} {
    %c0 = arith.constant 0 : index
    %c0_0 = arith.constant 0 : index
    %0 = vector.load %arg3[%c0, %c0_0] : memref<32x4xf32, #tpu.memory_space<vmem>>, vector<32x4xf32>
    %c0_1 = arith.constant 0 : index
    %c0_2 = arith.constant 0 : index
    %c0_3 = arith.constant 0 : index
    %1 = vector.load %arg2[%c0_1, %c0_2, %c0_3] : memref<1x4x128xf32, #tpu.memory_space<vmem>>, vector<1x4x128xf32>
    %2 = vector.shape_cast %1 : vector<1x4x128xf32> to vector<4x128xf32>
    %cst = arith.constant dense<0.000000e+00> : vector<32x128xf32>
    %3 = tpu.matmul %0, %2, %cst {dimension_numbers = #tpu.dot_dimension_numbers<[1], [0], [0], [1], [0, 0, 1, 1], [], []>} : vector<32x4xf32>, vector<4x128xf32>, vector<32x128xf32> -> vector<32x128xf32>
    %c0_4 = arith.constant 0 : index
    %c0_5 = arith.constant 0 : index
    %4 = vector.load %arg4[%c0_4, %c0_5] : memref<32x1xf32, #tpu.memory_space<vmem>>, vector<32x1xf32>
    %5 = vector.broadcast %4 : vector<32x1xf32> to vector<32x128xf32>
    %6 = arith.addf %3, %5 : vector<32x128xf32>
    %c0_6 = arith.constant 0 : index
    %c0_7 = arith.constant 0 : index
    %c0_8 = arith.constant 0 : index
    %7 = vector.load %arg5[%c0_6, %c0_7, %c0_8] : memref<1x32x128xf32, #tpu.memory_space<vmem>>, vector<1x32x128xf32>
    %8 = vector.shape_cast %7 : vector<1x32x128xf32> to vector<32x128xf32>
    %9 = vector.shape_cast %6 : vector<32x128xf32> to vector<1x32x128xf32>
    tpu.vector_store %arg5[%c0_6, %c0_7, %c0_8], %9 {strides = array<i32>} : memref<1x32x128xf32, #tpu.memory_space<vmem>>, vector<1x32x128xf32>,
    return
  }
  func.func @transform_0(%arg0: i32, %arg1: i32) -> (i32, i32, i32) {
    %c0_i32 = arith.constant 0 : i32
    %c0_i32_0 = arith.constant 0 : i32
    return %arg0, %c0_i32, %arg1 : i32, i32, i32
  }
  func.func @transform_1(%arg0: i32, %arg1: i32) -> (i32, i32) {
    %c0_i32 = arith.constant 0 : i32
    %c0_i32_0 = arith.constant 0 : i32
    %c0_i32_1 = arith.constant 0 : i32
    return %c0_i32, %c0_i32_0 : i32, i32
  }
  func.func @transform_2(%arg0: i32, %arg1: i32) -> (i32, i32) {
    %c0_i32 = arith.constant 0 : i32
    %c0_i32_0 = arith.constant 0 : i32
    %c0_i32_1 = arith.constant 0 : i32
    return %c0_i32, %c0_i32_0 : i32, i32
  }
  func.func @transform_3(%arg0: i32, %arg1: i32) -> (i32, i32, i32) {
    %c0_i32 = arith.constant 0 : i32
    %c0_i32_0 = arith.constant 0 : i32
    return %arg0, %c0_i32, %arg1 : i32, i32, i32
  }
}

</mosaic_0001>

<bundles_post_ra>
// kernel: tpu_custom_call.1
= control target key start
LH: loop header
LB: loop body
LE: loop exit
PB: predicated region body
PF: predicated region fallthrough
CT: control target
= control target key end

     0   :  { %8 = vsyncpa [#allocation3], 0  ;;  %s756_s0 = inlined_call_operand.vmem [shape: f32[2,4,128], index: 0, kind: input, shape index: {}]   ;;  %s757_s1 = inlined_call_operand.vmem [shape: f32[32,4], index: 1, kind: input, shape index: {}]   ;;  %s758_s2 = inlined_call_operand.vmem [shape: f32[32,1], index: 2, kind: input, shape index: {}]   ;;  %s759_s3 = inlined_call_operand.hbm [shape: f32[2,32,128], index: 3, kind: output, shape index: {}]  }
   0x1   :  { %10 = vsyncpa [#allocation3 + $0x1], 0  ;;  %s613_s12 = smov 0   ;;  %s615_s13 = smov 0  }
   0x2   :  { %s617_s14 = smov 0   ;;  %s619_s15 = smov 0  }
   0x3   :  { %s621_s16 = smov 0   ;;  %s623_s17 = smov 0  }
   0x4 LB: > { %s416_s18 = sadd.s32 4294967295, %s587_s17   ;;  %s417_s19 = sadd.s32 4294967294, %s587_s17   ;;  %s587_s17 = sphi %s623_s17, %s16_s17   ;;  %s583_s16 = sphi %s621_s16, %s766_s16   ;;  %s579_s15 = sphi %s619_s15, %s765_s15   ;;  %s575_s14 = sphi %s617_s14, %s764_s14   ;;  %s571_s13 = sphi %s615_s13, %s763_s13   ;;  %s567_s12 = sphi %s613_s12, %s762_s12  }
   0x5   : > { %s28_s20 = sadd.s32 1, %s583_s16  ;;  %s107_s21 = sadd.s32 1, %s575_s14 }
   0x6   : > { %p30_p0 = scmp.ge.s32.totalorder %s28_s20, 2  ;;  %p117_p1 = scmp.ne.s32.totalorder %s575_s14, %s571_s13 }
   0x7   : > { %p118_p2 = scmp.eq.s32.totalorder %s416_s18, 1  ;;  %p123_p3 = scmp.ne.s32.totalorder %s571_s13, %s567_s12 }
   0x8   : > { %s768_s20 = smov (%p30_p0, %s28_s20), 0  ;;  %p124_p5 = scmp.eq.s32.totalorder %s417_s19, 1 }
   0x9   : > { %p653_p4 = por %p118_p2, %p117_p1  ;;  %s102_s23 = ssub.s32 %s583_s16, %s768_s20 }
   0xa   : > { %p420_p6 = scmp.ge.s32.totalorder %s587_s17, 1  ;;  %p105_p7 = scmp.eq.s32.totalorder %s102_s23, 0 }
   0xb   : > { %p660_p8 = por %p124_p5, %p123_p3  ;;  %p158_p9 = scmp.lt.s32.totalorder %s587_s17, 3 }
   0xc   : > { %s666_s25 = scalar_select %p105_p7, %s575_s14, %s107_s21  }
   0xd   : > { %p159_p10 = pnand %p420_p6, %p158_p9 }
   0xe   : > { %p184_p11 = scmp.lt.s32.totalorder (!%p159_p10), %s579_s15, 1  ;;  %v191_v0 = vld [vmem:[%s757_s1] sm:$0xff] (!%p159_p10)  ;;  %vm220_vm0 = vcmask (!%p159_p10), 31744   ;;  %v193_v1 = vld [vmem:[%s757_s1 + $0x10] sm:$0xff] (!%p159_p10)  ;;  %v589_v4 = vmov (!%p159_p10), 0   ;;  %vm233_vm1 = vcmask (!%p159_p10), 1043456  }
   0xf   : > { %162 = sbr.rel (%p159_p10) target bundleno = 259 (0x103), region = 32  ;;  %441 = vmatprep.mubr.msk.f32.mxu0 (!%p159_p10), %vm220_vm0, %v191_v0  ;;  %444 = vmatprep.mubr.msk.f32.mxu1 (!%p159_p10), %vm220_vm0, %v193_v1  ;;  %v198_v2 = vld [vmem:[%s758_s2 + $0x10] sm:$0xff] (!%p159_p10)  ;;  %v196_v3 = vld [vmem:[%s758_s2] sm:$0xff] (!%p159_p10)  ;;  %v192_v6 = vld [vmem:[%s757_s1 + $0x8] sm:$0xff] (!%p159_p10)  ;;  %s181_s30 = sand.u32 (!%p159_p10), 1, %s571_s13  }
  0x10   : > { %508 = vset.pattern.permute.xlu1 (!%p159_p10), %v589_v4  ;;  %507 = vset.pattern.permute.xlu0 (!%p159_p10), %v589_v4  ;;  %v194_v7 = vld [vmem:[%s757_s1 + $0x18] sm:$0xff] (!%p159_p10)  ;;  %v197_v9 = vld [vmem:[%s758_s2 + $0x8] sm:$0xff] (!%p159_p10)  ;;  %s421_s4 = sshll.u32 (!%p159_p10), %s181_s30, 5  ;;  %s590_s18 = smov (!%p159_p10), [#allocation2]  }
  0x11   : > { %212 = vperm.xlu1 (!%p159_p10), %508, %v198_v2   ;;  %202 = vperm.xlu0 (!%p159_p10), %507, %v196_v3   ;;  %v199_v8 = vld [vmem:[%s758_s2 + $0x18] sm:$0xff] (!%p159_p10)  ;;  %s183_s5 = scalar_lea.vmem (!%p159_p10), [#allocation2], %s421_s4  ;;  %s513_s19 = sshll.u32 (!%p159_p10), %s590_s18, 4  ;;  %s514_s19 = int_to_ptr.vmem [resolvable:$false] %s513_s19 }
  0x12   : > { %s341_s6 = sshll.u32 (!%p159_p10), %s183_s5, 4  ;;  %s515_s21 = scalar_lea.vmem (!%p159_p10), %s514_s19, 1024  ;;  %s703_s6 = int_to_ptr.vmem [resolvable:$true] %s341_s6 }
  0x13   : > { %p516_p1 = scmp.lt.s32.totalorder (!%p159_p10), %s703_s6, %s514_s19 }
  0x15   : > { %217 = vperm.xlu1 (!%p159_p10), %508, %v199_v8   ;;  %207 = vperm.xlu0 (!%p159_p10), %507, %v197_v9  }
  0x16   : > { %s185_s7 = scalar_select %p184_p11, %s579_s15, 1 }
  0x18   : > { %s422_s8 = sshll.u32 %s185_s7, 2  ;;  %s433_s7 = sshll.u32 %s579_s15, 9 }
  0x19   : > { %s190_s11 = scalar_lea.vmem %s756_s0, %s422_s8  ;;  %s708_s10 = scalar_lea.hbm %s759_s3, %s433_s7 }
  0x1a   : > { %v195_v5 = vld [vmem:[%s190_s11] sm:$0xf]  ;;  %s710_s15 = scalar_lea.sflag [#allocation3], %s181_s30  ;;  %s509_s11 = scalar_lea.vmem %s703_s6, 512 }
  0x1b   : > { %439 = vmatprep.subr.msk.mxu0 %vm233_vm1, %v195_v5  ;;  %447 = vmatprep.subr.msk.mxu1 %vm233_vm1, %v195_v5  ;;  %p510_p12 = scmp.ne.s32.totalorder %s703_s6, %s509_s11  ;;  %p517_p2 = scmp.lt.s32.totalorder %s515_s21, %s509_s11 }
  0x1c   : > { %440 = vmatpush3.msk.msra.mxu0 %vm233_vm1, %v195_v5  ;;  %448 = vmatpush3.msk.msra.mxu1 %vm233_vm1, %v195_v5 }
  0x1d   : > { %442 = vmatmul.mubr.msk.f32.vlgmr.msra.gmra.mrb[0].mxu0 %vm220_vm0, %v192_v6  ;;  %445 = vmatmul.mubr.msk.f32.vlgmr.msra.gmra.mrb[0].mxu1 %vm220_vm0, %v194_v7  ;;  %p511_p13 = pnand %p510_p12, %p653_p4  ;;  %p518_p3 = por %p517_p2, %p516_p1 }
  0x1f   : > { %p512_p0 = pneg %p511_p13 }
  0x21   : > { %p519_p5 = pnand %p518_p3, %p512_p0 }
  0x90   : > { %v213_v10 = vpop.permute.xlu1 %212  ;;  %v203_v11 = vpop.permute.xlu0 %202 }
  0x94   : > { %v218_v12 = vpop.permute.xlu1 %217  ;;  %v208_v13 = vpop.permute.xlu0 %207 }
  0xf0   : > { %v443_v14 = vpop.f32.mrb[0].mxu0  ;;  %v446_v15 = vpop.f32.mrb[0].mxu1 }
  0xf1   : > { %v309_v16 = vadd.f32 %v443_v14, %v208_v13  ;;  %v319_v17 = vadd.f32 %v446_v15, %v218_v12  ;;  %v303_v18 = vpop.f32.mrb[1].mxu0  ;;  %v313_v19 = vpop.f32.mrb[1].mxu1 }
  0xf2   : > { %v304_v20 = vadd.f32 %v303_v18, %v203_v11  ;;  %v314_v21 = vadd.f32 %v313_v19, %v213_v10 }
  0xf3   : > { %323 = vst [vmem:[%s183_s5 + $0x8] sm:$0xff] %v309_v16  ;;  %325 = vst [vmem:[%s183_s5 + $0x18] sm:$0xff] %v319_v17 }
  0xf4   : > { %322 = vst [vmem:[%s183_s5] sm:$0xff] %v304_v20  ;;  %324 = vst [vmem:[%s183_s5 + $0x10] sm:$0xff] %v314_v21 }
  0xf5   : > { %522 = shalt.err (!%p519_p5)
}
  0xf6   : > { %s523_s23 = scalar_lea.hbm %s708_s10, 512  ;;  %s527_s28 = scalar_lea.hbm %s759_s3, 1024 }
  0xf7   : > { %p524_p6 = scmp.ne.s32.totalorder %s708_s10, %s523_s23  ;;  %p528_p10 = scmp.lt.u32.totalorder %s708_s10, %s759_s3 }
  0xf8   : > { %p529_p11 = scmp.lt.u32.totalorder %s527_s28, %s523_s23  ;;  %p531_p13 = scmp.lt.u32.totalorder %s523_s23, %s708_s10 }
  0xf9   : > { %p525_p7 = pnand %p524_p6, %p653_p4 }
  0xfa   : > { %p530_p12 = por %p529_p11, %p528_p10 }
  0xfb   : > { %p526_p9 = pneg %p525_p7 }
  0xfc   : > { %p532_p0 = por %p531_p13, %p530_p12 }
  0xfe   : > { %p533_p1 = pnand %p532_p0, %p526_p9 }
 0x100   : > { %536 = shalt.err (!%p533_p1)
}
 0x101   : > { %s591_s4 = smov 128   ;;  %s592_s5 = smov 8  }
 0x102   : > { %449 = dma.vmem_to_hbm [thread:$0]  (%p653_p4), %s703_s6, 512, %s708_s10, %s710_s15, %s591_s4, %s591_s4, %s592_s5  }
 0x103 PF: > { %p455_p2 = scmp.ge.s32.totalorder %s587_s17, 2  ;;  %s356_s7 = sand.u32 1, %s567_s12  }
 0x104   : > { %s357_s8 = scalar_lea.sflag [#allocation3], %s356_s7 }
 0x105   : > { %p452_p3 = pnand %p455_p2, %p660_p8 }
 0x107   : > { %562 = dma.done.wait (!%p452_p3), %s357_s8, 512  }
 0x108   : > { %564 = vsyncadd (!%p452_p3), %s357_s8, 4294966784  ;;  %s16_s17 = sadd.s32 1, %s587_s17   ;;  %s762_s12 = smov %s571_s13 }
 0x109   : > { %p13_p5 = scmp.ge.s32.totalorder %s16_s17, 4   ;;  %s763_s13 = smov %s575_s14 }
 0x10a   : > { %s764_s14 = smov %s666_s25  ;;  %s765_s15 = smov %s583_s16 }
 0x10b   : > { %s766_s16 = smov %s768_s20  ;;  %15 = sbr.rel (!%p13_p5) target bundleno = 4 (0x4), region = 67 }
 0x112   :  { %362 = vsyncpa [#allocation3], 1 }
 0x113   :  { %364 = vsyncpa [#allocation3 + $0x1], 1 }

</bundles_post_ra>
